<compile_context>
chip_gen: v7x
topology: tpu7x:2x2x1
jax: 0.10.0
libtpu: 0.0.40
codegen_flags: <defaults>
</compile_context>

<pallas_src>
import functools

import jax
import jax.numpy as jnp
import numpy as np
from jax.experimental import pallas as pl
from jax.experimental.pallas import tpu as pltpu  # noqa: F401  (kept for TPU-specific params if needed)


# --------------------------------- kernel -----------------------------------

def _ffc_kernel(x_ref, k_ref, w_ref, o_ref):
    # x_ref : (B*C_in,  HW)          VMEM  all (batch, channel) rows, flattened spatial
    # k_ref : (HW, 4*HW)             VMEM  fused spatial kernels [K00 | K01 | K10 | K11]
    # w_ref : (B*C_out, 4*B*C_in)    VMEM  batch-block-diagonal 1x1 channel-mix weight
    # o_ref : (B*C_out, HW)          VMEM  lane-dense output slab
    hw = o_ref.shape[-1]

    # Stage 1: one MXU matmul applies all four fused (rfft2 . conv-path . irfft2)
    # spatial kernels to every (batch, channel) row at once.
    t = jnp.dot(x_ref[...], k_ref[...],
                preferred_element_type=jnp.float32)                  # (B*C_in, 4*HW)

    # Re-stack the four 128-lane-aligned lane blocks onto sublanes (cheap copies,
    # no masked stores) so the channel mix is a single contraction of length
    # 4*B*C_in.
    tstack = jnp.concatenate(
        [t[:, 0 * hw:1 * hw], t[:, 1 * hw:2 * hw],
         t[:, 2 * hw:3 * hw], t[:, 3 * hw:4 * hw]], axis=0)          # (4*B*C_in, HW)

    # Stage 2: one small MXU matmul does the 1x1 conv channel mixing.
    out = jnp.dot(w_ref[...], tstack,
                  preferred_element_type=jnp.float32)                # (B*C_out, HW)
    o_ref[...] = out.astype(o_ref.dtype)


# ----------------------- host-side constant construction ---------------------

@functools.lru_cache(maxsize=None)
def _fused_spatial_kernels(H, W):
    """Dense fused rfft2/irfft2 spatial kernels, (HW, 4*HW) float32.

    Lane blocks (in order): K00 = MFr@MIR, K01 = MFi@MIR, K10 = MFr@MII,
    K11 = MFi@MII, where MFr/MFi are the real/imag forward rfft2 matrices and
    MIR/MII the irfft2 matrices applied to Re(G)/Im(G) (standard half-spectrum
    weighting: w_l = 1 for DC/Nyquist columns, 2 otherwise).
    """
    Wf = W // 2 + 1
    k = np.arange(H, dtype=np.float64)[:, None, None, None]
    l = np.arange(Wf, dtype=np.float64)[None, :, None, None]
    n = np.arange(H, dtype=np.float64)[None, None, :, None]
    m = np.arange(W, dtype=np.float64)[None, None, None, :]
    phase = 2.0 * np.pi * ((k * n / H + l * m / W) % 1.0)            # (H, Wf, H, W)
    cosp = np.cos(phase).reshape(H * Wf, H * W)
    sinp = np.sin(phase).reshape(H * Wf, H * W)

    mfr = cosp.T                        # (HW, HWf): Re rfft2
    mfi = -sinp.T                       # (HW, HWf): Im rfft2

    wl = np.full(Wf, 2.0)
    wl[0] = 1.0
    if W % 2 == 0:
        wl[W // 2] = 1.0
    row_scale = np.tile(wl, H)[:, None] / float(H * W)               # (HWf, 1)
    mir = row_scale * cosp              # (HWf, HW): applied to Re(G)
    mii = -row_scale * sinp             # (HWf, HW): applied to Im(G)

    k00 = mfr @ mir
    k01 = mfi @ mir
    k10 = mfr @ mii
    k11 = mfi @ mii
    kbig = np.concatenate([k00, k01, k10, k11], axis=1)              # (HW, 4*HW)
    return np.ascontiguousarray(kbig.astype(np.float32))


def _mix_matrix(weight, B, c_in, c_out):
    """(2*C_out, 2*C_in, 1, 1) conv weight -> batch-block-diag (B*C_out, 4*B*C_in)."""
    w2d = weight.reshape(2 * c_out, 2 * c_in).astype(jnp.float32)
    # xy order matches the K-block order: [Re<-Re, Re<-Im, Im<-Re, Im<-Im]
    wxy = jnp.stack([w2d[0::2, 0::2], w2d[0::2, 1::2],
                     w2d[1::2, 0::2], w2d[1::2, 1::2]], axis=0)      # (4, C_out, C_in)
    eye_b = jnp.eye(B, dtype=jnp.float32)
    wall = jnp.einsum('xoc,bd->boxdc', wxy, eye_b)                   # (B,C_out,4,B,C_in)
    return wall.reshape(B * c_out, 4 * B * c_in)


# --------------------------------- wrapper -----------------------------------

def ffc(x, weight):
    """FFC forward. x: (B, C_in, H, W) f32; weight: (2*C_out, 2*C_in, 1, 1)."""
    B, C_in, H, W = x.shape
    C_out = weight.shape[0] // 2
    assert weight.shape[1] == 2 * C_in and weight.shape[2:] == (1, 1)
    hw = H * W
    m_in, m_out = B * C_in, B * C_out

    kbig = jnp.asarray(_fused_spatial_kernels(H, W))                 # (HW, 4*HW) f32
    wall = _mix_matrix(weight, B, C_in, C_out)                       # (B*C_out, 4*B*C_in)
    x2 = x.astype(jnp.float32).reshape(m_in, hw)

    flops = 2 * (m_in * hw * 4 * hw + m_out * (4 * m_in) * hw)
    bytes_accessed = 4 * (m_in * hw + hw * 4 * hw + m_out * 4 * m_in + m_out * hw)

    out = pl.pallas_call(
        _ffc_kernel,
        out_shape=jax.ShapeDtypeStruct((m_out, hw), jnp.float32),
        in_specs=[
            pl.BlockSpec((m_in, hw), lambda: (0, 0)),
            pl.BlockSpec((hw, 4 * hw), lambda: (0, 0)),
            pl.BlockSpec((m_out, 4 * m_in), lambda: (0, 0)),
        ],
        out_specs=pl.BlockSpec((m_out, hw), lambda: (0, 0)),
        cost_estimate=pl.CostEstimate(flops=flops, transcendentals=0,
                                      bytes_accessed=bytes_accessed),
    )(x2, kbig, wall)
    return out.reshape(B, C_out, H, W)


# ----------------------- reference (numpy / pocketfft) -----------------------

def ffc_ref(x, weight):
    """Same math as the PyTorch module, in float64 with numpy's pocketfft."""
    x = np.asarray(x, dtype=np.float64)
    B, C, H, W = x.shape
    w2d = np.asarray(weight, dtype=np.float64).reshape(weight.shape[0],
                                                       weight.shape[1])
    f = np.fft.rfft2(x, axes=(-2, -1))
    z = np.stack([f.real, f.imag], axis=2).reshape(B, 2 * C, H, -1)
    y = np.einsum('oc,bchw->bohw', w2d, z)
    y = y.reshape(B, -1, 2, H, y.shape[-1])
    g = y[:, :, 0] + 1j * y[:, :, 1]
    return np.fft.irfft2(g, s=(H, W), axes=(-2, -1))


# ----------------------------------- main ------------------------------------

if __name__ == "__main__":
    key = jax.random.PRNGKey(0)
    kx, kw = jax.random.split(key, 2)

    B, C_in, C_out, H, W = 2, 4, 8, 16, 16
    x = jax.random.normal(kx, (B, C_in, H, W), dtype=jnp.float32)
    fan_in = 2 * C_in                     # Conv2d(2*C_in -> 2*C_out, 1x1) fan-in
    bound = 1.0 / (fan_in ** 0.5)
    weight = jax.random.uniform(kw, (2 * C_out, 2 * C_in, 1, 1), jnp.float32,
                                -bound, bound)

    out = jax.block_until_ready(ffc(x, weight))
    assert out.shape == (B, C_out, H, W), out.shape

    ref = ffc_ref(x, weight)
    out_np = np.asarray(out)
    max_err = float(np.max(np.abs(out_np - ref)))
    if not np.allclose(out_np, ref, atol=2e-3, rtol=2e-3):
        raise AssertionError(f"kernel mismatch vs reference, max abs err={max_err}")

    print("KERNEL_OK")
</pallas_src>

<mosaic_0001>
module attributes {stable_mosaic.version = 11 : i64} {
  func.func @_ffc_kernel(%arg0: memref<8x256xf32, #tpu.memory_space<vmem>>, %arg1: memref<256x1024xf32, #tpu.memory_space<vmem>>, %arg2: memref<16x32xf32, #tpu.memory_space<vmem>>, %arg3: memref<16x256xf32, #tpu.memory_space<vmem>>) attributes {dimension_semantics = [], scalar_prefetch = 0 : i64, scratch_operands = 0 : i64, tpu.core_type = #tpu.core_type<tc>} {
    %c0 = arith.constant 0 : index
    %c0_0 = arith.constant 0 : index
    %0 = vector.load %arg0[%c0, %c0_0] : memref<8x256xf32, #tpu.memory_space<vmem>>, vector<8x256xf32>
    %c0_1 = arith.constant 0 : index
    %c0_2 = arith.constant 0 : index
    %1 = vector.load %arg1[%c0_1, %c0_2] : memref<256x1024xf32, #tpu.memory_space<vmem>>, vector<256x1024xf32>
    %cst = arith.constant dense<0.000000e+00> : vector<8x1024xf32>
    %2 = tpu.matmul %0, %1, %cst {dimension_numbers = #tpu.dot_dimension_numbers<[1], [0], [0], [1], [0, 0, 1, 1], [], []>} : vector<8x256xf32>, vector<256x1024xf32>, vector<8x1024xf32> -> vector<8x1024xf32>
    %3 = vector.extract_strided_slice %2 {offsets = [0, 0], sizes = [8, 256], strides = [1, 1]} : vector<8x1024xf32> to vector<8x256xf32>
    %4 = vector.extract_strided_slice %2 {offsets = [0, 256], sizes = [8, 256], strides = [1, 1]} : vector<8x1024xf32> to vector<8x256xf32>
    %5 = vector.extract_strided_slice %2 {offsets = [0, 512], sizes = [8, 256], strides = [1, 1]} : vector<8x1024xf32> to vector<8x256xf32>
    %6 = vector.extract_strided_slice %2 {offsets = [0, 768], sizes = [8, 256], strides = [1, 1]} : vector<8x1024xf32> to vector<8x256xf32>
    %7 = tpu.concatenate %3, %4, %5, %6 in 0 : vector<8x256xf32>, vector<8x256xf32>, vector<8x256xf32>, vector<8x256xf32> -> vector<32x256xf32>
    %c0_3 = arith.constant 0 : index
    %c0_4 = arith.constant 0 : index
    %8 = vector.load %arg2[%c0_3, %c0_4] : memref<16x32xf32, #tpu.memory_space<vmem>>, vector<16x32xf32>
    %cst_5 = arith.constant dense<0.000000e+00> : vector<16x256xf32>
    %9 = tpu.matmul %8, %7, %cst_5 {dimension_numbers = #tpu.dot_dimension_numbers<[1], [0], [0], [1], [0, 0, 1, 1], [], []>} : vector<16x32xf32>, vector<32x256xf32>, vector<16x256xf32> -> vector<16x256xf32>
    %c0_6 = arith.constant 0 : index
    %c0_7 = arith.constant 0 : index
    %10 = vector.load %arg3[%c0_6, %c0_7] : memref<16x256xf32, #tpu.memory_space<vmem>>, vector<16x256xf32>
    tpu.vector_store %arg3[%c0_6, %c0_7], %9 {strides = array<i32>} : memref<16x256xf32, #tpu.memory_space<vmem>>, vector<16x256xf32>,
    return
  }
}

</mosaic_0001>

<bundles_post_ra>
// kernel: tpu_custom_call.1
= control target key start
LH: loop header
LB: loop body
LE: loop exit
PB: predicated region body
PF: predicated region fallthrough
CT: control target
= control target key end

     0   :  { %8 = vsyncpa [#allocation3], 0  ;;  %s1170_s0 = inlined_call_operand.hbm [shape: f32[8,256], index: 0, kind: input, shape index: {}]   ;;  %s1171_s1 = inlined_call_operand.hbm [shape: f32[256,1024], index: 1, kind: input, shape index: {}]   ;;  %s1172_s2 = inlined_call_operand.hbm [shape: f32[16,32], index: 2, kind: input, shape index: {}]   ;;  %s1173_s3 = inlined_call_operand.hbm [shape: f32[16,256], index: 3, kind: output, shape index: {}]  }
   0x1   :  { %9 = vsyncpa [#allocation6], 0 }
   0x2   :  { %10 = vsyncpa [#allocation4], 0  ;;  %s1079_s12 = smov [#allocation5]   ;;  %s985_s16 = scalar_lea.hbm %s1171_s1, 32768 }
   0x3   :  { %s26_s13 = sshll.u32 %s1079_s12, 4  ;;  %p986_p0 = scmp.ne.s32.totalorder %s1171_s1, %s985_s16  ;;  %s27_s13 = int_to_ptr.vmem [resolvable:$true] %s26_s13 }
   0x4   :  { %p989_p1 = scmp.lt.u32.totalorder %s985_s16, %s1171_s1 }
   0x6   :  { %p991_p2 = pnand %p989_p1, %p986_p0 }
   0x8   :  { %994 = shalt.err (!%p991_p2)
}
   0x9   :  { %s995_s21 = scalar_lea.vmem %s27_s13, 32768  ;;  %p1000_p4 = scmp.lt.s32.totalorder %s27_s13, %s27_s13 }
   0xa   :  { %p996_p3 = scmp.ne.s32.totalorder %s27_s13, %s995_s21  ;;  %p1001_p5 = scmp.lt.s32.totalorder %s995_s21, %s995_s21 }
   0xc   :  { %p1002_p6 = por %p1001_p5, %p1000_p4 }
   0xe   :  { %p1003_p7 = pnand %p1002_p6, %p996_p3 }
  0x10   :  { %1006 = shalt.err (!%p1003_p7)
}
  0x11   :  { %s1080_s22 = smov 1024   ;;  %s1081_s23 = smov 64  }
  0x12   :  { %32 = dma.hbm_to_vmem [thread:$0]  %s1171_s1, 32768, %s27_s13, [#allocation6], %s1080_s22, %s1080_s22, %s1081_s23  }
  0x13   :  { %s1082_s26 = smov [#allocation2]   ;;  %s1083_s28 = smov [#allocation7]  }
  0x14   :  { %s17_s27 = sshll.u32 %s1082_s26, 4  ;;  %s38_s29 = sshll.u32 %s1083_s28, 4  ;;  %s18_s27 = int_to_ptr.vmem [resolvable:$true] %s17_s27  ;;  %s39_s29 = int_to_ptr.vmem [resolvable:$true] %s38_s29 }
  0x15   :  { %s1007_s5 = scalar_lea.hbm %s1170_s0, 256 }
  0x16   :  { %p1008_p8 = scmp.ne.s32.totalorder %s1170_s0, %s1007_s5  ;;  %p1011_p9 = scmp.lt.u32.totalorder %s1007_s5, %s1170_s0 }
  0x18   :  { %p1013_p10 = pnand %p1011_p9, %p1008_p8 }
  0x1a   :  { %1016 = shalt.err (!%p1013_p10)
}
  0x1b   :  { %s1017_s1 = scalar_lea.vmem %s18_s27, 256  ;;  %p1022_p12 = scmp.lt.s32.totalorder %s18_s27, %s18_s27 }
  0x1c   :  { %p1018_p11 = scmp.ne.s32.totalorder %s18_s27, %s1017_s1  ;;  %p1023_p13 = scmp.lt.s32.totalorder %s1017_s1, %s1017_s1 }
  0x1e   :  { %p1024_p0 = por %p1023_p13, %p1022_p12 }
  0x20   :  { %p1025_p1 = pnand %p1024_p0, %p1018_p11 }
  0x22   :  { %1028 = shalt.err (!%p1025_p1)
}
  0x23   :  { %20 = dma.hbm_to_vmem [thread:$0]  %s1170_s0, 256, %s18_s27, [#allocation3]  }
  0x24   :  { %s1029_s14 = scalar_lea.hbm %s1172_s2, 256 }
  0x25   :  { %p1030_p2 = scmp.ne.s32.totalorder %s1172_s2, %s1029_s14  ;;  %p1033_p3 = scmp.lt.u32.totalorder %s1029_s14, %s1172_s2 }
  0x27   :  { %p1035_p4 = pnand %p1033_p3, %p1030_p2 }
  0x29   :  { %1038 = shalt.err (!%p1035_p4)
}
  0x2a   :  { %s1039_s19 = scalar_lea.vmem %s39_s29, 256  ;;  %p1044_p6 = scmp.lt.s32.totalorder %s39_s29, %s39_s29 }
  0x2b   :  { %p1040_p5 = scmp.ne.s32.totalorder %s39_s29, %s1039_s19  ;;  %p1045_p7 = scmp.lt.s32.totalorder %s1039_s19, %s1039_s19 }
  0x2d   :  { %p1046_p8 = por %p1045_p7, %p1044_p6 }
  0x2f   :  { %p1047_p9 = pnand %p1046_p8, %p1040_p5 }
  0x31   :  { %1050 = shalt.err (!%p1047_p9)
}
  0x32   :  { %s1084_s0 = smov 128   ;;  %s1085_s20 = smov 8  }
  0x33   :  { %44 = dma.hbm_to_vmem [thread:$0]  %s1172_s2, 256, %s39_s29, [#allocation6], %s1084_s0, %s1084_s0, %s1085_s20  }
  0x34   :  { %1073 = dma.done.wait [#allocation3], 256  }
  0x35   :  { %1074 = vsyncadd [#allocation3], 4294967040 }
  0x36   :  { %1075 = dma.done.wait [#allocation6], 33024  }
  0x37   :  { %1076 = vsyncadd [#allocation6], 4294934272  ;;  %v57_v0 = vld [vmem:[#allocation5 + $0x8] sm:$0xff]  ;;  %v59_v2 = vld [vmem:[#allocation5 + $0x18] sm:$0xff]  ;;  %vm598_vm0 = vcmask 261120   ;;  %s1087_s2 = smov [#allocation8]  }
  0x38   :  { %v65_v1 = vld [vmem:[#allocation5 + $0x48] sm:$0xff]  ;;  %v67_v4 = vld [vmem:[#allocation5 + $0x58] sm:$0xff]  ;;  %v56_v5 = vld [vmem:[#allocation5] sm:$0xff]  ;;  %s691_s23 = sshll.u32 %s1087_s2, 4  ;;  %s692_s23 = int_to_ptr.vmem [resolvable:$true] %s691_s23 }
  0x39   :  { %v706_v3 = vpack.c.bf16 %v65_v1, %v57_v0  ;;  %v64_v6 = vld [vmem:[#allocation5 + $0x40] sm:$0xff]  ;;  %v770_v7 = vpack.c.bf16 %v67_v4, %v59_v2  ;;  %v58_v9 = vld [vmem:[#allocation5 + $0x10] sm:$0xff]  ;;  %v73_v11 = vld [vmem:[#allocation5 + $0x88] sm:$0xff]  ;;  %s1051_s24 = scalar_lea.vmem %s692_s23, 512  ;;  %p1056_p11 = scmp.lt.s32.totalorder %s692_s23, %s692_s23 }
  0x3a   :  { %v708_v8 = vpack.c.bf16 %v64_v6, %v56_v5  ;;  %v66_v10 = vld [vmem:[#allocation5 + $0x50] sm:$0xff]  ;;  %v81_v13 = vld [vmem:[#allocation5 + $0xc8] sm:$0xff]  ;;  %v75_v14 = vld [vmem:[#allocation5 + $0x98] sm:$0xff]  ;;  %p1052_p10 = scmp.ne.s32.totalorder %s692_s23, %s1051_s24  ;;  %p1057_p12 = scmp.lt.s32.totalorder %s1051_s24, %s1051_s24 }
  0x3b   :  { %707 = vmatprep.subr.bf16.mxu0 %v706_v3  ;;  %v772_v12 = vpack.c.bf16 %v66_v10, %v58_v9  ;;  %v83_v15 = vld [vmem:[#allocation5 + $0xd8] sm:$0xff]  ;;  %771 = vmatprep.subr.bf16.mxu1 %v770_v7  ;;  %v710_v16 = vpack.c.bf16 %v81_v13, %v73_v11  ;;  %v72_v18 = vld [vmem:[#allocation5 + $0x80] sm:$0xff]  ;;  %v74_v20 = vld [vmem:[#allocation5 + $0x90] sm:$0xff] }
  0x3c   :  { %709 = vmatpush1.bf16.msra.mxu0 %v708_v8  ;;  %v774_v17 = vpack.c.bf16 %v83_v15, %v75_v14  ;;  %v80_v19 = vld [vmem:[#allocation5 + $0xc0] sm:$0xff]  ;;  %v82_v22 = vld [vmem:[#allocation5 + $0xd0] sm:$0xff]  ;;  %v89_v23 = vld [vmem:[#allocation5 + $0x108] sm:$0xff]  ;;  %p1058_p13 = por %p1057_p12, %p1056_p11 }
  0x3d   :  { %773 = vmatpush1.bf16.msra.mxu1 %v772_v12  ;;  %v712_v21 = vpack.c.bf16 %v80_v19, %v72_v18  ;;  %v97_v24 = vld [vmem:[#allocation5 + $0x148] sm:$0xff]  ;;  %711 = vmatprep.subr.bf16.mxu0 %v710_v16  ;;  %v776_v25 = vpack.c.bf16 %v82_v22, %v74_v20  ;;  %v91_v27 = vld [vmem:[#allocation5 + $0x118] sm:$0xff]  ;;  %v88_v29 = vld [vmem:[#allocation5 + $0x100] sm:$0xff] }
  0x3e   :  { %775 = vmatprep.subr.bf16.mxu1 %v774_v17  ;;  %v714_v26 = vpack.c.bf16 %v97_v24, %v89_v23  ;;  %v99_v28 = vld [vmem:[#allocation5 + $0x158] sm:$0xff]  ;;  %v96_v31 = vld [vmem:[#allocation5 + $0x140] sm:$0xff]  ;;  %v90_v32 = vld [vmem:[#allocation5 + $0x110] sm:$0xff]  ;;  %p1059_p0 = pnand %p1058_p13, %p1052_p10 }
  0x3f   :  { %v778_v30 = vpack.c.bf16 %v99_v28, %v91_v27  ;;  %v98_v33 = vld [vmem:[#allocation5 + $0x150] sm:$0xff]  ;;  %v716_v34 = vpack.c.bf16 %v96_v31, %v88_v29  ;;  %v105_v35 = vld [vmem:[#allocation5 + $0x188] sm:$0xff]  ;;  %v107_v37 = vld [vmem:[#allocation5 + $0x198] sm:$0xff] }
  0x40   :  { %713 = vmatpush1.bf16.msra.mxu0 %v712_v21  ;;  %v113_v36 = vld [vmem:[#allocation5 + $0x1c8] sm:$0xff]  ;;  %v780_v38 = vpack.c.bf16 %v98_v33, %v90_v32  ;;  %v115_v40 = vld [vmem:[#allocation5 + $0x1d8] sm:$0xff]  ;;  %v104_v41 = vld [vmem:[#allocation5 + $0x180] sm:$0xff] }
  0x41   :  { %777 = vmatpush1.bf16.msra.mxu1 %v776_v25  ;;  %715 = vmatprep.subr.bf16.mxu0 %v714_v26  ;;  %v718_v39 = vpack.c.bf16 %v113_v36, %v105_v35  ;;  %v112_v42 = vld [vmem:[#allocation5 + $0x1c0] sm:$0xff]  ;;  %v782_v43 = vpack.c.bf16 %v115_v40, %v107_v37  ;;  %v106_v44 = vld [vmem:[#allocation5 + $0x190] sm:$0xff]  ;;  %v121_v46 = vld [vmem:[#allocation5 + $0x208] sm:$0xff] }
  0x42   :  { %779 = vmatprep.subr.bf16.mxu1 %v778_v30  ;;  %v114_v45 = vld [vmem:[#allocation5 + $0x1d0] sm:$0xff]  ;;  %v129_v47 = vld [vmem:[#allocation5 + $0x248] sm:$0xff]  ;;  %v123_v48 = vld [vmem:[#allocation5 + $0x218] sm:$0xff]  ;;  %v720_v50 = vpack.c.bf16 %v112_v42, %v104_v41 }
  0x43   :  { %v131_v49 = vld [vmem:[#allocation5 + $0x258] sm:$0xff]  ;;  %v784_v51 = vpack.c.bf16 %v114_v45, %v106_v44  ;;  %v722_v52 = vpack.c.bf16 %v129_v47, %v121_v46  ;;  %v120_v53 = vld [vmem:[#allocation5 + $0x200] sm:$0xff]  ;;  %v122_v55 = vld [vmem:[#allocation5 + $0x210] sm:$0xff] }
  0x44   :  { %717 = vmatpush1.bf16.msra.mxu0 %v716_v34  ;;  %v128_v54 = vld [vmem:[#allocation5 + $0x240] sm:$0xff]  ;;  %v786_v56 = vpack.c.bf16 %v131_v49, %v123_v48  ;;  %v130_v57 = vld [vmem:[#allocation5 + $0x250] sm:$0xff]  ;;  %v137_v58 = vld [vmem:[#allocation5 + $0x288] sm:$0xff] }
  0x45   :  { %781 = vmatpush1.bf16.msra.mxu1 %v780_v38  ;;  %719 = vmatprep.subr.bf16.mxu0 %v718_v39  ;;  %v145_v59 = vld [vmem:[#allocation5 + $0x2c8] sm:$0xff]  ;;  %v139_v60 = vld [vmem:[#allocation5 + $0x298] sm:$0xff]  ;;  %v724_v62 = vpack.c.bf16 %v128_v54, %v120_v53  ;;  %v788_v63 = vpack.c.bf16 %v130_v57, %v122_v55  ;;  %v136_v1 = vld [vmem:[#allocation5 + $0x280] sm:$0xff] }
  0x46   :  { %783 = vmatprep.subr.bf16.mxu1 %v782_v43  ;;  %v147_v61 = vld [vmem:[#allocation5 + $0x2d8] sm:$0xff]  ;;  %v726_v0 = vpack.c.bf16 %v145_v59, %v137_v58  ;;  %v144_v2 = vld [vmem:[#allocation5 + $0x2c0] sm:$0xff]  ;;  %v138_v3 = vld [vmem:[#allocation5 + $0x290] sm:$0xff] }
  0x47   :  { %v790_v4 = vpack.c.bf16 %v147_v61, %v139_v60  ;;  %v146_v5 = vld [vmem:[#allocation5 + $0x2d0] sm:$0xff]  ;;  %v153_v6 = vld [vmem:[#allocation5 + $0x308] sm:$0xff]  ;;  %v155_v8 = vld [vmem:[#allocation5 + $0x318] sm:$0xff]  ;;  %v728_v10 = vpack.c.bf16 %v144_v2, %v136_v1 }
  0x48   :  { %721 = vmatpush1.bf16.msra.mxu0 %v720_v50  ;;  %v161_v7 = vld [vmem:[#allocation5 + $0x348] sm:$0xff]  ;;  %v163_v9 = vld [vmem:[#allocation5 + $0x358] sm:$0xff]  ;;  %v792_v11 = vpack.c.bf16 %v146_v5, %v138_v3  ;;  %v152_v13 = vld [vmem:[#allocation5 + $0x300] sm:$0xff] }
  0x49   :  { %785 = vmatpush1.bf16.msra.mxu1 %v784_v51  ;;  %723 = vmatprep.subr.bf16.mxu0 %v722_v52  ;;  %v730_v12 = vpack.c.bf16 %v161_v7, %v153_v6  ;;  %v160_v14 = vld [vmem:[#allocation5 + $0x340] sm:$0xff]  ;;  %v154_v15 = vld [vmem:[#allocation5 + $0x310] sm:$0xff]  ;;  %v794_v16 = vpack.c.bf16 %v163_v9, %v155_v8  ;;  %v169_v18 = vld [vmem:[#allocation5 + $0x388] sm:$0xff] }
  0x4a   :  { %787 = vmatprep.subr.bf16.mxu1 %v786_v56  ;;  %v162_v17 = vld [vmem:[#allocation5 + $0x350] sm:$0xff]  ;;  %v177_v19 = vld [vmem:[#allocation5 + $0x3c8] sm:$0xff]  ;;  %v171_v20 = vld [vmem:[#allocation5 + $0x398] sm:$0xff]  ;;  %v732_v22 = vpack.c.bf16 %v160_v14, %v152_v13 }
  0x4b   :  { %v179_v21 = vld [vmem:[#allocation5 + $0x3d8] sm:$0xff]  ;;  %v796_v23 = vpack.c.bf16 %v162_v17, %v154_v15  ;;  %v734_v24 = vpack.c.bf16 %v177_v19, %v169_v18  ;;  %v168_v25 = vld [vmem:[#allocation5 + $0x380] sm:$0xff]  ;;  %v170_v27 = vld [vmem:[#allocation5 + $0x390] sm:$0xff] }
  0x4c   :  { %725 = vmatpush1.bf16.msra.mxu0 %v724_v62  ;;  %v176_v26 = vld [vmem:[#allocation5 + $0x3c0] sm:$0xff]  ;;  %v798_v28 = vpack.c.bf16 %v179_v21, %v171_v20  ;;  %v178_v29 = vld [vmem:[#allocation5 + $0x3d0] sm:$0xff]  ;;  %v185_v30 = vld [vmem:[#allocation5 + $0x408] sm:$0xff] }
  0x4d   :  { %789 = vmatpush1.bf16.msra.mxu1 %v788_v63  ;;  %727 = vmatprep.subr.bf16.mxu0 %v726_v0  ;;  %v193_v31 = vld [vmem:[#allocation5 + $0x448] sm:$0xff]  ;;  %v187_v32 = vld [vmem:[#allocation5 + $0x418] sm:$0xff]  ;;  %v736_v34 = vpack.c.bf16 %v176_v26, %v168_v25  ;;  %v800_v35 = vpack.c.bf16 %v178_v29, %v170_v27  ;;  %v184_v37 = vld [vmem:[#allocation5 + $0x400] sm:$0xff] }
  0x4e   :  { %791 = vmatprep.subr.bf16.mxu1 %v790_v4  ;;  %v195_v33 = vld [vmem:[#allocation5 + $0x458] sm:$0xff]  ;;  %v738_v36 = vpack.c.bf16 %v193_v31, %v185_v30  ;;  %v192_v38 = vld [vmem:[#allocation5 + $0x440] sm:$0xff]  ;;  %v186_v39 = vld [vmem:[#allocation5 + $0x410] sm:$0xff] }
  0x4f   :  { %v802_v40 = vpack.c.bf16 %v195_v33, %v187_v32  ;;  %v194_v41 = vld [vmem:[#allocation5 + $0x450] sm:$0xff]  ;;  %v201_v42 = vld [vmem:[#allocation5 + $0x488] sm:$0xff]  ;;  %v203_v44 = vld [vmem:[#allocation5 + $0x498] sm:$0xff]  ;;  %v740_v46 = vpack.c.bf16 %v192_v38, %v184_v37 }
  0x50   :  { %729 = vmatpush1.bf16.msra.mxu0 %v728_v10  ;;  %v209_v43 = vld [vmem:[#allocation5 + $0x4c8] sm:$0xff]  ;;  %v211_v45 = vld [vmem:[#allocation5 + $0x4d8] sm:$0xff]  ;;  %v804_v47 = vpack.c.bf16 %v194_v41, %v186_v39  ;;  %v200_v49 = vld [vmem:[#allocation5 + $0x480] sm:$0xff] }
  0x51   :  { %793 = vmatpush1.bf16.msra.mxu1 %v792_v11  ;;  %731 = vmatprep.subr.bf16.mxu0 %v730_v12  ;;  %v742_v48 = vpack.c.bf16 %v209_v43, %v201_v42  ;;  %v208_v50 = vld [vmem:[#allocation5 + $0x4c0] sm:$0xff]  ;;  %v202_v51 = vld [vmem:[#allocation5 + $0x490] sm:$0xff]  ;;  %v806_v52 = vpack.c.bf16 %v211_v45, %v203_v44  ;;  %v217_v54 = vld [vmem:[#allocation5 + $0x508] sm:$0xff] }
  0x52   :  { %795 = vmatprep.subr.bf16.mxu1 %v794_v16  ;;  %v210_v53 = vld [vmem:[#allocation5 + $0x4d0] sm:$0xff]  ;;  %v225_v55 = vld [vmem:[#allocation5 + $0x548] sm:$0xff]  ;;  %v219_v56 = vld [vmem:[#allocation5 + $0x518] sm:$0xff]  ;;  %v744_v58 = vpack.c.bf16 %v208_v50, %v200_v49 }
  0x53   :  { %v227_v57 = vld [vmem:[#allocation5 + $0x558] sm:$0xff]  ;;  %v808_v59 = vpack.c.bf16 %v210_v53, %v202_v51  ;;  %v746_v60 = vpack.c.bf16 %v225_v55, %v217_v54  ;;  %v216_v61 = vld [vmem:[#allocation5 + $0x500] sm:$0xff]  ;;  %v218_v63 = vld [vmem:[#allocation5 + $0x510] sm:$0xff] }
  0x54   :  { %733 = vmatpush1.bf16.msra.mxu0 %v732_v22  ;;  %v224_v62 = vld [vmem:[#allocation5 + $0x540] sm:$0xff]  ;;  %v810_v0 = vpack.c.bf16 %v227_v57, %v219_v56  ;;  %v226_v1 = vld [vmem:[#allocation5 + $0x550] sm:$0xff]  ;;  %v233_v2 = vld [vmem:[#allocation5 + $0x588] sm:$0xff] }
  0x55   :  { %797 = vmatpush1.bf16.msra.mxu1 %v796_v23  ;;  %735 = vmatprep.subr.bf16.mxu0 %v734_v24  ;;  %v241_v3 = vld [vmem:[#allocation5 + $0x5c8] sm:$0xff]  ;;  %v235_v4 = vld [vmem:[#allocation5 + $0x598] sm:$0xff]  ;;  %v748_v6 = vpack.c.bf16 %v224_v62, %v216_v61  ;;  %v232_v7 = vld [vmem:[#allocation5 + $0x580] sm:$0xff]  ;;  %v812_v8 = vpack.c.bf16 %v226_v1, %v218_v63 }
  0x56   :  { %799 = vmatprep.subr.bf16.mxu1 %v798_v28  ;;  %v243_v5 = vld [vmem:[#allocation5 + $0x5d8] sm:$0xff]  ;;  %v750_v9 = vpack.c.bf16 %v241_v3, %v233_v2  ;;  %v240_v10 = vld [vmem:[#allocation5 + $0x5c0] sm:$0xff]  ;;  %v234_v11 = vld [vmem:[#allocation5 + $0x590] sm:$0xff] }
  0x57   :  { %v242_v12 = vld [vmem:[#allocation5 + $0x5d0] sm:$0xff]  ;;  %v814_v13 = vpack.c.bf16 %v243_v5, %v235_v4  ;;  %v249_v14 = vld [vmem:[#allocation5 + $0x608] sm:$0xff]  ;;  %v1146_v16 = vld [vmem:[#allocation2 + $0x8] sm:$0xff]  ;;  %v752_v19 = vpack.c.bf16 %v240_v10, %v232_v7 }
  0x58   :  { %737 = vmatpush1.bf16.msra.mxu0 %v736_v34  ;;  %v257_v15 = vld [vmem:[#allocation5 + $0x648] sm:$0xff]  ;;  %v251_v17 = vld [vmem:[#allocation5 + $0x618] sm:$0xff]  ;;  %376 = vmatprep.mubr.f32.mxu0 %v1146_v16  ;;  %v816_v20 = vpack.c.bf16 %v242_v12, %v234_v11  ;;  %v248_v22 = vld [vmem:[#allocation5 + $0x600] sm:$0xff] }
  0x59   :  { %801 = vmatpush1.bf16.msra.mxu1 %v800_v35  ;;  %739 = vmatprep.subr.bf16.mxu0 %v738_v36  ;;  %v259_v18 = vld [vmem:[#allocation5 + $0x658] sm:$0xff]  ;;  %v754_v21 = vpack.c.bf16 %v257_v15, %v249_v14  ;;  %v256_v23 = vld [vmem:[#allocation5 + $0x640] sm:$0xff]  ;;  %v250_v24 = vld [vmem:[#allocation5 + $0x610] sm:$0xff] }
  0x5a   :  { %803 = vmatprep.subr.bf16.mxu1 %v802_v40  ;;  %447 = vmatprep.mubr.f32.mxu1 %v1146_v16  ;;  %v818_v25 = vpack.c.bf16 %v259_v18, %v251_v17  ;;  %v258_v26 = vld [vmem:[#allocation5 + $0x650] sm:$0xff]  ;;  %v265_v27 = vld [vmem:[#allocation5 + $0x688] sm:$0xff]  ;;  %v267_v29 = vld [vmem:[#allocation5 + $0x698] sm:$0xff]  ;;  %v756_v31 = vpack.c.bf16 %v256_v23, %v248_v22 }
  0x5b   :  { %v273_v28 = vld [vmem:[#allocation5 + $0x6c8] sm:$0xff]  ;;  %v275_v30 = vld [vmem:[#allocation5 + $0x6d8] sm:$0xff]  ;;  %v820_v32 = vpack.c.bf16 %v258_v26, %v250_v24  ;;  %v264_v34 = vld [vmem:[#allocation5 + $0x680] sm:$0xff] }
  0x5c   :  { %741 = vmatpush1.bf16.msra.mxu0 %v740_v46  ;;  %v758_v33 = vpack.c.bf16 %v273_v28, %v265_v27  ;;  %v272_v35 = vld [vmem:[#allocation5 + $0x6c0] sm:$0xff]  ;;  %v266_v36 = vld [vmem:[#allocation5 + $0x690] sm:$0xff]  ;;  %v822_v37 = vpack.c.bf16 %v275_v30, %v267_v29  ;;  %v281_v39 = vld [vmem:[#allocation5 + $0x708] sm:$0xff] }
  0x5d   :  { %805 = vmatpush1.bf16.msra.mxu1 %v804_v47  ;;  %743 = vmatprep.subr.bf16.mxu0 %v742_v48  ;;  %v274_v38 = vld [vmem:[#allocation5 + $0x6d0] sm:$0xff]  ;;  %v289_v40 = vld [vmem:[#allocation5 + $0x748] sm:$0xff]  ;;  %v283_v41 = vld [vmem:[#allocation5 + $0x718] sm:$0xff]  ;;  %v760_v43 = vpack.c.bf16 %v272_v35, %v264_v34 }
  0x5e   :  { %807 = vmatprep.subr.bf16.mxu1 %v806_v52  ;;  %v291_v42 = vld [vmem:[#allocation5 + $0x758] sm:$0xff]  ;;  %v824_v44 = vpack.c.bf16 %v274_v38, %v266_v36  ;;  %v762_v45 = vpack.c.bf16 %v289_v40, %v281_v39  ;;  %v280_v46 = vld [vmem:[#allocation5 + $0x700] sm:$0xff]  ;;  %v282_v48 = vld [vmem:[#allocation5 + $0x710] sm:$0xff] }
  0x5f   :  { %v288_v47 = vld [vmem:[#allocation5 + $0x740] sm:$0xff]  ;;  %v826_v49 = vpack.c.bf16 %v291_v42, %v283_v41  ;;  %v290_v50 = vld [vmem:[#allocation5 + $0x750] sm:$0xff]  ;;  %v297_v51 = vld [vmem:[#allocation5 + $0x788] sm:$0xff] }
  0x60   :  { %745 = vmatpush1.bf16.msra.mxu0 %v744_v58  ;;  %v305_v52 = vld [vmem:[#allocation5 + $0x7c8] sm:$0xff]  ;;  %v299_v53 = vld [vmem:[#allocation5 + $0x798] sm:$0xff]  ;;  %v764_v55 = vpack.c.bf16 %v288_v47, %v280_v46  ;;  %v828_v56 = vpack.c.bf16 %v290_v50, %v282_v48  ;;  %v296_v58 = vld [vmem:[#allocation5 + $0x780] sm:$0xff] }
  0x61   :  { %809 = vmatpush1.bf16.msra.mxu1 %v808_v59  ;;  %747 = vmatprep.subr.bf16.mxu0 %v746_v60  ;;  %v307_v54 = vld [vmem:[#allocation5 + $0x7d8] sm:$0xff]  ;;  %v766_v57 = vpack.c.bf16 %v305_v52, %v297_v51  ;;  %v304_v59 = vld [vmem:[#allocation5 + $0x7c0] sm:$0xff]  ;;  %v298_v60 = vld [vmem:[#allocation5 + $0x790] sm:$0xff] }
  0x62   :  { %811 = vmatprep.subr.bf16.mxu1 %v810_v0  ;;  %v830_v61 = vpack.c.bf16 %v307_v54, %v299_v53  ;;  %v306_v62 = vld [vmem:[#allocation5 + $0x7d0] sm:$0xff]  ;;  %v61_v63 = vld [vmem:[#allocation5 + $0x28] sm:$0xff]  ;;  %v63_v1 = vld [vmem:[#allocation5 + $0x38] sm:$0xff]  ;;  %v768_v3 = vpack.c.bf16 %v304_v59, %v296_v58 }
  0x63   :  { %v69_v0 = vld [vmem:[#allocation5 + $0x68] sm:$0xff]  ;;  %v71_v2 = vld [vmem:[#allocation5 + $0x78] sm:$0xff]  ;;  %v832_v4 = vpack.c.bf16 %v306_v62, %v298_v60  ;;  %v68_v7 = vld [vmem:[#allocation5 + $0x60] sm:$0xff] }
  0x64   :  { %749 = vmatpush1.bf16.msra.mxu0 %v748_v6  ;;  %v834_v5 = vpack.c.bf16 %v69_v0, %v61_v63  ;;  %v60_v6 = vld [vmem:[#allocation5 + $0x20] sm:$0xff]  ;;  %v70_v10 = vld [vmem:[#allocation5 + $0x70] sm:$0xff]  ;;  %v77_v11 = vld [vmem:[#allocation5 + $0xa8] sm:$0xff] }
  0x65   :  { %813 = vmatpush1.bf16.msra.mxu1 %v812_v8  ;;  %751 = vmatprep.subr.bf16.mxu0 %v750_v9  ;;  %v62_v8 = vld [vmem:[#allocation5 + $0x30] sm:$0xff]  ;;  %v898_v9 = vpack.c.bf16 %v71_v2, %v63_v1  ;;  %v85_v12 = vld [vmem:[#allocation5 + $0xe8] sm:$0xff]  ;;  %v87_v14 = vld [vmem:[#allocation5 + $0xf8] sm:$0xff]  ;;  %v836_v17 = vpack.c.bf16 %v68_v7, %v60_v6 }
  0x66   :  { %815 = vmatprep.subr.bf16.mxu1 %v814_v13  ;;  %v79_v13 = vld [vmem:[#allocation5 + $0xb8] sm:$0xff]  ;;  %v1150_v15 = vld [vmem:[#allocation2] sm:$0xff]  ;;  %v900_v18 = vpack.c.bf16 %v70_v10, %v62_v8  ;;  %v101_v26 = vld [vmem:[#allocation5 + $0x168] sm:$0xff] }
  0x67   :  { %v78_v22 = vld [vmem:[#allocation5 + $0xb0] sm:$0xff]  ;;  %v902_v23 = vpack.c.bf16 %v87_v14, %v79_v13  ;;  %v95_v27 = vld [vmem:[#allocation5 + $0x138] sm:$0xff]  ;;  %v117_v38 = vld [vmem:[#allocation5 + $0x1e8] sm:$0xff] }
  0x68   :  { %753 = vmatpush1.bf16.msra.mxu0 %v752_v19  ;;  %v838_v19 = vpack.c.bf16 %v85_v12, %v77_v11  ;;  %v86_v24 = vld [vmem:[#allocation5 + $0xf0] sm:$0xff]  ;;  %v103_v28 = vld [vmem:[#allocation5 + $0x178] sm:$0xff]  ;;  %v133_v50 = vld [vmem:[#allocation5 + $0x268] sm:$0xff] }
  0x69   :  { %817 = vmatpush1.bf16.msra.mxu1 %v816_v20  ;;  %755 = vmatprep.subr.bf16.mxu0 %v754_v21  ;;  %v76_v20 = vld [vmem:[#allocation5 + $0xa0] sm:$0xff]  ;;  %v904_v30 = vpack.c.bf16 %v86_v24, %v78_v22  ;;  %v94_v34 = vld [vmem:[#allocation5 + $0x130] sm:$0xff]  ;;  %v906_v35 = vpack.c.bf16 %v103_v28, %v95_v27  ;;  %v111_v39 = vld [vmem:[#allocation5 + $0x1b8] sm:$0xff] }
  0x6a   :  { %819 = vmatprep.subr.bf16.mxu1 %v818_v25  ;;  %v84_v21 = vld [vmem:[#allocation5 + $0xe0] sm:$0xff]  ;;  %v93_v25 = vld [vmem:[#allocation5 + $0x128] sm:$0xff]  ;;  %v102_v36 = vld [vmem:[#allocation5 + $0x170] sm:$0xff] }
  0x6b   :  { %v840_v29 = vpack.c.bf16 %v84_v21, %v76_v20  ;;  %v119_v40 = vld [vmem:[#allocation5 + $0x1f8] sm:$0xff]  ;;  %v908_v42 = vpack.c.bf16 %v102_v36, %v94_v34  ;;  %v110_v46 = vld [vmem:[#allocation5 + $0x1b0] sm:$0xff]  ;;  %v141_v60 = vld [vmem:[#allocation5 + $0x2a8] sm:$0xff] }
  0x6c   :  { %757 = vmatpush1.bf16.msra.mxu0 %v756_v31  ;;  %v842_v31 = vpack.c.bf16 %v101_v26, %v93_v25  ;;  %v910_v47 = vpack.c.bf16 %v119_v40, %v111_v39  ;;  %v118_v48 = vld [vmem:[#allocation5 + $0x1f0] sm:$0xff]  ;;  %v127_v51 = vld [vmem:[#allocation5 + $0x238] sm:$0xff]  ;;  %v157_v8 = vld [vmem:[#allocation5 + $0x328] sm:$0xff] }
  0x6d   :  { %821 = vmatpush1.bf16.msra.mxu1 %v820_v32  ;;  %759 = vmatprep.subr.bf16.mxu0 %v758_v33  ;;  %v92_v32 = vld [vmem:[#allocation5 + $0x120] sm:$0xff]  ;;  %v135_v52 = vld [vmem:[#allocation5 + $0x278] sm:$0xff]  ;;  %v134_v59 = vld [vmem:[#allocation5 + $0x270] sm:$0xff] }
  0x6e   :  { %823 = vmatprep.subr.bf16.mxu1 %v822_v37  ;;  %v100_v33 = vld [vmem:[#allocation5 + $0x160] sm:$0xff]  ;;  %v109_v37 = vld [vmem:[#allocation5 + $0x1a8] sm:$0xff]  ;;  %v914_v58 = vpack.c.bf16 %v135_v52, %v127_v51  ;;  %v143_v62 = vld [vmem:[#allocation5 + $0x2b8] sm:$0xff] }
  0x6f   :  { %v844_v41 = vpack.c.bf16 %v100_v33, %v92_v32  ;;  %v151_v63 = vld [vmem:[#allocation5 + $0x2f8] sm:$0xff]  ;;  %v150_v7 = vld [vmem:[#allocation5 + $0x2f0] sm:$0xff]  ;;  %v173_v22 = vld [vmem:[#allocation5 + $0x3a8] sm:$0xff] }
  0x70   :  { %761 = vmatpush1.bf16.msra.mxu0 %v760_v43  ;;  %v846_v43 = vpack.c.bf16 %v117_v38, %v109_v37  ;;  %v918_v6 = vpack.c.bf16 %v151_v63, %v143_v62  ;;  %v159_v10 = vld [vmem:[#allocation5 + $0x338] sm:$0xff]  ;;  %v166_v21 = vld [vmem:[#allocation5 + $0x370] sm:$0xff]  ;;  %v189_v34 = vld [vmem:[#allocation5 + $0x428] sm:$0xff] }
  0x71   :  { %825 = vmatpush1.bf16.msra.mxu1 %v824_v44  ;;  %763 = vmatprep.subr.bf16.mxu0 %v762_v45  ;;  %v108_v44 = vld [vmem:[#allocation5 + $0x1a0] sm:$0xff]  ;;  %v167_v11 = vld [vmem:[#allocation5 + $0x378] sm:$0xff]  ;;  %v182_v33 = vld [vmem:[#allocation5 + $0x3f0] sm:$0xff] }
  0x72   :  { %827 = vmatprep.subr.bf16.mxu1 %v826_v49  ;;  %v116_v45 = vld [vmem:[#allocation5 + $0x1e0] sm:$0xff]  ;;  %v125_v49 = vld [vmem:[#allocation5 + $0x228] sm:$0xff]  ;;  %v922_v20 = vpack.c.bf16 %v167_v11, %v159_v10  ;;  %v175_v24 = vld [vmem:[#allocation5 + $0x3b8] sm:$0xff] }
  0x73   :  { %v848_v53 = vpack.c.bf16 %v116_v45, %v108_v44  ;;  %v850_v54 = vpack.c.bf16 %v133_v50, %v125_v49  ;;  %v183_v25 = vld [vmem:[#allocation5 + $0x3f8] sm:$0xff]  ;;  %v198_v45 = vld [vmem:[#allocation5 + $0x470] sm:$0xff] }
  0x74   :  { %765 = vmatpush1.bf16.msra.mxu0 %v764_v55  ;;  %v124_v55 = vld [vmem:[#allocation5 + $0x220] sm:$0xff]  ;;  %v926_v32 = vpack.c.bf16 %v183_v25, %v175_v24  ;;  %v191_v36 = vld [vmem:[#allocation5 + $0x438] sm:$0xff] }
  0x75   :  { %829 = vmatpush1.bf16.msra.mxu1 %v828_v56  ;;  %767 = vmatprep.subr.bf16.mxu0 %v766_v57  ;;  %v132_v56 = vld [vmem:[#allocation5 + $0x260] sm:$0xff]  ;;  %v126_v57 = vld [vmem:[#allocation5 + $0x230] sm:$0xff]  ;;  %v199_v37 = vld [vmem:[#allocation5 + $0x478] sm:$0xff] }
  0x76   :  { %831 = vmatprep.subr.bf16.mxu1 %v830_v61  ;;  %v149_v61 = vld [vmem:[#allocation5 + $0x2e8] sm:$0xff]  ;;  %v852_v0 = vpack.c.bf16 %v132_v56, %v124_v55  ;;  %v916_v1 = vpack.c.bf16 %v134_v59, %v126_v57  ;;  %v930_v44 = vpack.c.bf16 %v199_v37, %v191_v36  ;;  %v215_v49 = vld [vmem:[#allocation5 + $0x4f8] sm:$0xff]  ;;  %v214_v56 = vld [vmem:[#allocation5 + $0x4f0] sm:$0xff] }
  0x77   :  { %v854_v2 = vpack.c.bf16 %v149_v61, %v141_v60  ;;  %v221_v57 = vld [vmem:[#allocation5 + $0x528] sm:$0xff]  ;;  %v223_v59 = vld [vmem:[#allocation5 + $0x538] sm:$0xff] }
  0x78   :  { %769 = vmatpush1.bf16.msra.mxu0 %v768_v3  ;;  %v140_v3 = vld [vmem:[#allocation5 + $0x2a0] sm:$0xff]  ;;  %v231_v60 = vld [vmem:[#allocation5 + $0x578] sm:$0xff] }
  0x79   :  { %833 = vmatpush1.bf16.msra.mxu1 %v832_v4  ;;  %835 = vmatprep.subr.bf16.mxu0 %v834_v5  ;;  %v148_v4 = vld [vmem:[#allocation5 + $0x2e0] sm:$0xff]  ;;  %v142_v5 = vld [vmem:[#allocation5 + $0x2b0] sm:$0xff] }
  0x7a   :  { %899 = vmatprep.subr.bf16.mxu1 %v898_v9  ;;  %v165_v9 = vld [vmem:[#allocation5 + $0x368] sm:$0xff]  ;;  %v856_v12 = vpack.c.bf16 %v148_v4, %v140_v3  ;;  %v920_v13 = vpack.c.bf16 %v150_v7, %v142_v5  ;;  %v938_v3 = vpack.c.bf16 %v231_v60, %v223_v59  ;;  %v230_v4 = vld [vmem:[#allocation5 + $0x570] sm:$0xff]  ;;  %v239_v7 = vld [vmem:[#allocation5 + $0x5b8] sm:$0xff] }
  0x7b   :  { %377 = vmatmul.mubr.f32.vlgmr.msra.gmra.mrb[0].mxu0 %v1150_v15  ;;  %v858_v14 = vpack.c.bf16 %v165_v9, %v157_v8  ;;  %v237_v5 = vld [vmem:[#allocation5 + $0x5a8] sm:$0xff]  ;;  %v247_v8 = vld [vmem:[#allocation5 + $0x5f8] sm:$0xff] }
  0x7c   :  { %448 = vmatmul.mubr.f32.vlgmr.msra.gmra.mrb[0].mxu1 %v1150_v15  ;;  %837 = vmatpush1.bf16.msra.mxu0 %v836_v17  ;;  %v156_v17 = vld [vmem:[#allocation5 + $0x320] sm:$0xff] }
  0x7d   :  { %901 = vmatpush1.bf16.msra.mxu1 %v900_v18  ;;  %839 = vmatprep.subr.bf16.mxu0 %v838_v19  ;;  %v164_v18 = vld [vmem:[#allocation5 + $0x360] sm:$0xff]  ;;  %v158_v19 = vld [vmem:[#allocation5 + $0x330] sm:$0xff] }
  0x7e   :  { %903 = vmatprep.subr.bf16.mxu1 %v902_v23  ;;  %518 = vmatprep.mubr.f32.mxu0 %v1146_v16  ;;  %v181_v23 = vld [vmem:[#allocation5 + $0x3e8] sm:$0xff]  ;;  %v860_v26 = vpack.c.bf16 %v164_v18, %v156_v17  ;;  %v924_v27 = vpack.c.bf16 %v166_v21, %v158_v19  ;;  %v942_v17 = vpack.c.bf16 %v247_v8, %v239_v7  ;;  %v246_v18 = vld [vmem:[#allocation5 + $0x5f0] sm:$0xff]  ;;  %v255_v21 = vld [vmem:[#allocation5 + $0x638] sm:$0xff] }
  0x7f   :  { %589 = vmatprep.mubr.f32.mxu1 %v1146_v16  ;;  %v912_v16 = vpack.c.bf16 %v118_v48, %v110_v46  ;;  %v862_v28 = vpack.c.bf16 %v181_v23, %v173_v22  ;;  %v205_v46 = vld [vmem:[#allocation5 + $0x4a8] sm:$0xff]  ;;  %v207_v48 = vld [vmem:[#allocation5 + $0x4b8] sm:$0xff] }
  0x80   :  { %841 = vmatpush1.bf16.msra.mxu0 %v840_v29  ;;  %v172_v29 = vld [vmem:[#allocation5 + $0x3a0] sm:$0xff]  ;;  %v934_v55 = vpack.c.bf16 %v215_v49, %v207_v48  ;;  %v253_v19 = vld [vmem:[#allocation5 + $0x628] sm:$0xff]  ;;  %v263_v22 = vld [vmem:[#allocation5 + $0x678] sm:$0xff] }
  0x81   :  { %905 = vmatpush1.bf16.msra.mxu1 %v904_v30  ;;  %843 = vmatprep.subr.bf16.mxu0 %v842_v31  ;;  %v180_v30 = vld [vmem:[#allocation5 + $0x3e0] sm:$0xff]  ;;  %v174_v31 = vld [vmem:[#allocation5 + $0x3b0] sm:$0xff] }
  0x82   :  { %907 = vmatprep.subr.bf16.mxu1 %v906_v35  ;;  %v197_v35 = vld [vmem:[#allocation5 + $0x468] sm:$0xff]  ;;  %v864_v38 = vpack.c.bf16 %v180_v30, %v172_v29  ;;  %v928_v39 = vpack.c.bf16 %v182_v33, %v174_v31  ;;  %v946_v29 = vpack.c.bf16 %v263_v22, %v255_v21  ;;  %v262_v30 = vld [vmem:[#allocation5 + $0x670] sm:$0xff]  ;;  %v271_v33 = vld [vmem:[#allocation5 + $0x6b8] sm:$0xff] }
  0x83   :  { %v866_v40 = vpack.c.bf16 %v197_v35, %v189_v34  ;;  %v269_v31 = vld [vmem:[#allocation5 + $0x6a8] sm:$0xff]  ;;  %v279_v34 = vld [vmem:[#allocation5 + $0x6f8] sm:$0xff] }
  0x84   :  { %845 = vmatpush1.bf16.msra.mxu0 %v844_v41  ;;  %v188_v41 = vld [vmem:[#allocation5 + $0x420] sm:$0xff] }
  0x85   :  { %909 = vmatpush1.bf16.msra.mxu1 %v908_v42  ;;  %847 = vmatprep.subr.bf16.mxu0 %v846_v43  ;;  %v196_v42 = vld [vmem:[#allocation5 + $0x460] sm:$0xff]  ;;  %v190_v43 = vld [vmem:[#allocation5 + $0x430] sm:$0xff] }
  0x86   :  { %911 = vmatprep.subr.bf16.mxu1 %v910_v47  ;;  %v213_v47 = vld [vmem:[#allocation5 + $0x4e8] sm:$0xff]  ;;  %v868_v50 = vpack.c.bf16 %v196_v42, %v188_v41  ;;  %v932_v51 = vpack.c.bf16 %v198_v45, %v190_v43  ;;  %v950_v41 = vpack.c.bf16 %v279_v34, %v271_v33  ;;  %v278_v42 = vld [vmem:[#allocation5 + $0x6f0] sm:$0xff]  ;;  %v287_v45 = vld [vmem:[#allocation5 + $0x738] sm:$0xff] }
  0x87   :  { %v870_v52 = vpack.c.bf16 %v213_v47, %v205_v46  ;;  %v285_v43 = vld [vmem:[#allocation5 + $0x728] sm:$0xff]  ;;  %v295_v46 = vld [vmem:[#allocation5 + $0x778] sm:$0xff] }
  0x88   :  { %849 = vmatpush1.bf16.msra.mxu0 %v848_v53  ;;  %v204_v53 = vld [vmem:[#allocation5 + $0x4a0] sm:$0xff] }
  0x89   :  { %913 = vmatpush1.bf16.msra.mxu1 %v912_v16  ;;  %851 = vmatprep.subr.bf16.mxu0 %v850_v54  ;;  %v212_v16 = vld [vmem:[#allocation5 + $0x4e0] sm:$0xff]  ;;  %v206_v54 = vld [vmem:[#allocation5 + $0x4b0] sm:$0xff] }
  0x8a   :  { %915 = vmatprep.subr.bf16.mxu1 %v914_v58  ;;  %v229_v58 = vld [vmem:[#allocation5 + $0x568] sm:$0xff]  ;;  %v872_v61 = vpack.c.bf16 %v212_v16, %v204_v53  ;;  %v936_v62 = vpack.c.bf16 %v214_v56, %v206_v54  ;;  %v954_v53 = vpack.c.bf16 %v295_v46, %v287_v45  ;;  %v294_v16 = vld [vmem:[#allocation5 + $0x770] sm:$0xff]  ;;  %v303_v56 = vld [vmem:[#allocation5 + $0x7b8] sm:$0xff] }
  0x8b   :  { %v874_v63 = vpack.c.bf16 %v229_v58, %v221_v57  ;;  %v301_v54 = vld [vmem:[#allocation5 + $0x7a8] sm:$0xff]  ;;  %v311_v57 = vld [vmem:[#allocation5 + $0x7f8] sm:$0xff] }
  0x8c   :  { %853 = vmatpush1.bf16.msra.mxu0 %v852_v0  ;;  %v220_v0 = vld [vmem:[#allocation5 + $0x520] sm:$0xff] }
  0x8d   :  { %917 = vmatpush1.bf16.msra.mxu1 %v916_v1  ;;  %855 = vmatprep.subr.bf16.mxu0 %v854_v2  ;;  %v228_v1 = vld [vmem:[#allocation5 + $0x560] sm:$0xff]  ;;  %v222_v2 = vld [vmem:[#allocation5 + $0x530] sm:$0xff] }
  0x8e   :  { %919 = vmatprep.subr.bf16.mxu1 %v918_v6  ;;  %v245_v6 = vld [vmem:[#allocation5 + $0x5e8] sm:$0xff]  ;;  %v876_v9 = vpack.c.bf16 %v228_v1, %v220_v0  ;;  %v940_v10 = vpack.c.bf16 %v230_v4, %v222_v2  ;;  %v302_v0 = vld [vmem:[#allocation5 + $0x7b0] sm:$0xff]  ;;  %v1086_v4 = vmov 0.0  }
  0x8f   :  { %v878_v11 = vpack.c.bf16 %v245_v6, %v237_v5  ;;  %v310_v1 = vld [vmem:[#allocation5 + $0x7f0] sm:$0xff] }
  0x90   :  { %857 = vmatpush1.bf16.msra.mxu0 %v856_v12  ;;  %v236_v12 = vld [vmem:[#allocation5 + $0x5a0] sm:$0xff] }
  0x91   :  { %921 = vmatpush1.bf16.msra.mxu1 %v920_v13  ;;  %859 = vmatprep.subr.bf16.mxu0 %v858_v14  ;;  %v244_v13 = vld [vmem:[#allocation5 + $0x5e0] sm:$0xff]  ;;  %v238_v14 = vld [vmem:[#allocation5 + $0x5b0] sm:$0xff] }
  0x92   :  { %923 = vmatprep.subr.bf16.mxu1 %v922_v20  ;;  %v261_v20 = vld [vmem:[#allocation5 + $0x668] sm:$0xff]  ;;  %v880_v23 = vpack.c.bf16 %v244_v13, %v236_v12  ;;  %v944_v24 = vpack.c.bf16 %v246_v18, %v238_v14 }
  0x93   :  { %v882_v25 = vpack.c.bf16 %v261_v20, %v253_v19  ;;  %v597_v19 = vld [vmem:[#allocation7 + $0x8] sm:$0xff] }
  0x94   :  { %861 = vmatpush1.bf16.msra.mxu0 %v860_v26  ;;  %v252_v26 = vld [vmem:[#allocation5 + $0x620] sm:$0xff] }
  0x95   :  { %925 = vmatpush1.bf16.msra.mxu1 %v924_v27  ;;  %863 = vmatprep.subr.bf16.mxu0 %v862_v28  ;;  %v260_v27 = vld [vmem:[#allocation5 + $0x660] sm:$0xff]  ;;  %v254_v28 = vld [vmem:[#allocation5 + $0x630] sm:$0xff] }
  0x96   :  { %927 = vmatprep.subr.bf16.mxu1 %v926_v32  ;;  %v277_v32 = vld [vmem:[#allocation5 + $0x6e8] sm:$0xff]  ;;  %v884_v35 = vpack.c.bf16 %v260_v27, %v252_v26  ;;  %v948_v36 = vpack.c.bf16 %v262_v30, %v254_v28 }
  0x97   :  { %v886_v37 = vpack.c.bf16 %v277_v32, %v269_v31 }
  0x98   :  { %865 = vmatpush1.bf16.msra.mxu0 %v864_v38  ;;  %v268_v38 = vld [vmem:[#allocation5 + $0x6a0] sm:$0xff] }
  0x99   :  { %929 = vmatpush1.bf16.msra.mxu1 %v928_v39  ;;  %867 = vmatprep.subr.bf16.mxu0 %v866_v40  ;;  %v276_v39 = vld [vmem:[#allocation5 + $0x6e0] sm:$0xff]  ;;  %v270_v40 = vld [vmem:[#allocation5 + $0x6b0] sm:$0xff] }
  0x9a   :  { %931 = vmatprep.subr.bf16.mxu1 %v930_v44  ;;  %v293_v44 = vld [vmem:[#allocation5 + $0x768] sm:$0xff]  ;;  %v888_v47 = vpack.c.bf16 %v276_v39, %v268_v38  ;;  %v952_v48 = vpack.c.bf16 %v278_v42, %v270_v40 }
  0x9b   :  { %v890_v49 = vpack.c.bf16 %v293_v44, %v285_v43 }
  0x9c   :  { %869 = vmatpush1.bf16.msra.mxu0 %v868_v50  ;;  %v284_v50 = vld [vmem:[#allocation5 + $0x720] sm:$0xff] }
  0x9d   :  { %933 = vmatpush1.bf16.msra.mxu1 %v932_v51  ;;  %871 = vmatprep.subr.bf16.mxu0 %v870_v52  ;;  %v292_v51 = vld [vmem:[#allocation5 + $0x760] sm:$0xff]  ;;  %v286_v52 = vld [vmem:[#allocation5 + $0x730] sm:$0xff] }
  0x9e   :  { %935 = vmatprep.subr.bf16.mxu1 %v934_v55  ;;  %v309_v55 = vld [vmem:[#allocation5 + $0x7e8] sm:$0xff]  ;;  %v892_v58 = vpack.c.bf16 %v292_v51, %v284_v50  ;;  %v956_v59 = vpack.c.bf16 %v294_v16, %v286_v52 }
  0x9f   :  { %v894_v60 = vpack.c.bf16 %v309_v55, %v301_v54 }
  0xa0   :  { %873 = vmatpush1.bf16.msra.mxu0 %v872_v61  ;;  %v300_v61 = vld [vmem:[#allocation5 + $0x7a0] sm:$0xff] }
  0xa1   :  { %937 = vmatpush1.bf16.msra.mxu1 %v936_v62  ;;  %875 = vmatprep.subr.bf16.mxu0 %v874_v63  ;;  %v308_v62 = vld [vmem:[#allocation5 + $0x7e0] sm:$0xff]  ;;  %v958_v63 = vpack.c.bf16 %v311_v57, %v303_v56 }
  0xa2   :  { %939 = vmatprep.subr.bf16.mxu1 %v938_v3  ;;  %v896_v2 = vpack.c.bf16 %v308_v62, %v300_v61  ;;  %v960_v3 = vpack.c.bf16 %v310_v1, %v302_v0 }
  0xa4   :  { %877 = vmatpush1.bf16.msra.mxu0 %v876_v9 }
  0xa5   :  { %941 = vmatpush1.bf16.msra.mxu1 %v940_v10  ;;  %879 = vmatprep.subr.bf16.mxu0 %v878_v11 }
  0xa6   :  { %943 = vmatprep.subr.bf16.mxu1 %v942_v17 }
  0xa8   :  { %881 = vmatpush1.bf16.msra.mxu0 %v880_v23 }
  0xa9   :  { %945 = vmatpush1.bf16.msra.mxu1 %v944_v24  ;;  %883 = vmatprep.subr.bf16.mxu0 %v882_v25 }
  0xaa   :  { %947 = vmatprep.subr.bf16.mxu1 %v946_v29 }
  0xac   :  { %885 = vmatpush1.bf16.msra.mxu0 %v884_v35 }
  0xad   :  { %949 = vmatpush1.bf16.msra.mxu1 %v948_v36  ;;  %887 = vmatprep.subr.bf16.mxu0 %v886_v37 }
  0xae   :  { %951 = vmatprep.subr.bf16.mxu1 %v950_v41 }
  0xb0   :  { %889 = vmatpush1.bf16.msra.mxu0 %v888_v47 }
  0xb1   :  { %953 = vmatpush1.bf16.msra.mxu1 %v952_v48  ;;  %891 = vmatprep.subr.bf16.mxu0 %v890_v49 }
  0xb2   :  { %955 = vmatprep.subr.bf16.mxu1 %v954_v53 }
  0xb4   :  { %893 = vmatpush1.bf16.msra.mxu0 %v892_v58 }
  0xb5   :  { %957 = vmatpush1.bf16.msra.mxu1 %v956_v59  ;;  %895 = vmatprep.subr.bf16.mxu0 %v894_v60 }
  0xb6   :  { %959 = vmatprep.subr.bf16.mxu1 %v958_v63 }
  0xb8   :  { %897 = vmatpush1.bf16.msra.mxu0 %v896_v2 }
  0xb9   :  { %961 = vmatpush1.bf16.msra.mxu1 %v960_v3 }
  0xbb   :  { %519 = vmatmul.mubr.f32.vlgmr.msra.gmra.mrb[2].mxu0 %v1150_v15 }
  0xbc   :  { %590 = vmatmul.mubr.f32.vlgmr.msra.gmra.mrb[2].mxu1 %v1150_v15  ;;  %669 = vmatprep.mubr.f32.mxu0 %v1086_v4  ;;  %v596_v15 = vld [vmem:[#allocation7] sm:$0xff] }
  0xbd   :  { %675 = vmatprep.mubr.f32.mxu1 %v1086_v4 }
 0x14e   :  { %v378_v5 = vpop.f32.mrb[0].mxu0 }
 0x14f   :  { %v449_v6 = vpop.f32.mrb[0].mxu1  ;;  %v380_v7 = vpop.f32.mrb[1].mxu0 }
 0x150   :  { %v964_v8 = vpack.c.bf16 %v449_v6, %v378_v5  ;;  %v451_v9 = vpop.f32.mrb[1].mxu1 }
 0x151   :  { %v962_v10 = vpack.c.bf16 %v451_v9, %v380_v7 }
 0x153   :  { %963 = vmatprep.subr.bf16.mxu0 %v962_v10  ;;  %970 = vmatprep.subr.bf16.mxu1 %v962_v10 }
 0x154   :  { %965 = vmatpush1.bf16.msra.mxu0 %v964_v8  ;;  %972 = vmatpush1.bf16.msra.mxu1 %v964_v8 }
 0x18e   :  { %v520_v11 = vpop.f32.mrb[2].mxu0 }
 0x18f   :  { %v591_v12 = vpop.f32.mrb[2].mxu1  ;;  %v522_v13 = vpop.f32.mrb[3].mxu0 }
 0x190   :  { %v968_v14 = vpack.c.bf16 %v591_v12, %v520_v11  ;;  %v593_v17 = vpop.f32.mrb[3].mxu1 }
 0x191   :  { %v966_v18 = vpack.c.bf16 %v593_v17, %v522_v13 }
 0x193   :  { %967 = vmatprep.subr.bf16.mxu0 %v966_v18  ;;  %971 = vmatprep.subr.bf16.mxu1 %v966_v18 }
 0x194   :  { %969 = vmatpush1.bf16.msra.mxu0 %v968_v14  ;;  %973 = vmatpush1.bf16.msra.mxu1 %v968_v14 }
 0x197   :  { %704 = vmatmul.mubr.msk.f32.vlgmr.msra.gmra.mrb[4].mxu0 %vm598_vm0, %v596_v15  ;;  %705 = vmatmul.mubr.msk.f32.vlgmr.msra.gmra.mrb[4].mxu1 %vm598_vm0, %v597_v19 }
 0x26a   :  { %v671_v20 = vpop.f32.mrb[4].mxu0  ;;  %v677_v21 = vpop.f32.mrb[4].mxu1 }
 0x26b   :  { %682 = vst [vmem:[#allocation8] sm:$0xff] %v671_v20  ;;  %684 = vst [vmem:[#allocation8 + $0x10] sm:$0xff] %v677_v21  ;;  %v673_v22 = vpop.f32.mrb[5].mxu0  ;;  %v679_v23 = vpop.f32.mrb[5].mxu1 }
 0x26c   :  { %683 = vst [vmem:[#allocation8 + $0x8] sm:$0xff] %v673_v22  ;;  %685 = vst [vmem:[#allocation8 + $0x18] sm:$0xff] %v679_v23 }
 0x26d   :  { %1062 = shalt.err (!%p1059_p0)
}
 0x26e   :  { %s1063_s27 = scalar_lea.hbm %s1173_s3, 512 }
 0x26f   :  { %p1064_p1 = scmp.ne.s32.totalorder %s1173_s3, %s1063_s27  ;;  %p1067_p2 = scmp.lt.u32.totalorder %s1063_s27, %s1173_s3 }
 0x271   :  { %p1069_p3 = pnand %p1067_p2, %p1064_p1 }
 0x273   :  { %1072 = shalt.err (!%p1069_p3)
}
 0x274   :  { %s1088_s5 = smov 256   ;;  %s1089_s6 = smov 16  }
 0x275   :  { %697 = dma.vmem_to_hbm [thread:$0]  %s692_s23, 512, %s1173_s3, [#allocation4], %s1088_s5, %s1088_s5, %s1089_s6  }
 0x276   :  { %1077 = dma.done.wait [#allocation4], 512  }
 0x277   :  { %1078 = vsyncadd [#allocation4], 4294966784 }
 0x278   :  { %701 = vsyncpa [#allocation3], 1 }
 0x279   :  { %702 = vsyncpa [#allocation6], 1 }
 0x27a   :  { %703 = vsyncpa [#allocation4], 1 }

</bundles_post_ra>
